<compile_context>
chip_gen: v5e
topology: v5e:2x2
jax: 0.10.0
libtpu: 0.0.40
codegen_flags: <defaults>
</compile_context>

<pallas_src>
import functools

import jax
import jax.numpy as jnp
from jax.experimental import pallas as pl
from jax.experimental.pallas import tpu as pltpu


def _pick_tile(dim, target, gran):
    """Largest multiple-of-`gran` divisor of `dim` that is <= target (or dim itself)."""
    if dim <= target:
        return dim
    t = (target // gran) * gran
    while t >= gran:
        if dim % t == 0:
            return t
        t -= gran
    return dim


# ----------------------------------------------------------------------------
# Kernel 1: tiled matmul + bias (+ optional tanh) — ConvTranspose2d(k=2, s=2)
# ----------------------------------------------------------------------------
def _matmul_bias_kernel(x_ref, w_ref, b_ref, o_ref, *, activation):
    acc = jnp.dot(x_ref[...].astype(jnp.bfloat16), w_ref[...],
                  preferred_element_type=jnp.float32)
    acc = acc + b_ref[...]
    if activation == "tanh":
        acc = jnp.tanh(acc)
    o_ref[...] = acc.astype(o_ref.dtype)


def conv_transpose_2x2_s2(x_nhwc, w_t, b_t, *, activation=None):
    """ConvTranspose2d(kernel=2, stride=2, padding=0).

    x_nhwc: (N, H, W, Cin) bf16;  w_t: (Cin, Cout, 2, 2);  b_t: (Cout,)
    returns (N, 2H, 2W, Cout) f32.
    """
    N, H, W, Cin = x_nhwc.shape
    Cout = w_t.shape[1]
    M = N * H * W
    Ctot = 4 * Cout
    Cpad = ((Ctot + 127) // 128) * 128          # lane-dense output columns

    x2d = x_nhwc.reshape(M, Cin)
    # column order: (kh, kw, cout)
    w2d = jnp.transpose(w_t, (0, 2, 3, 1)).reshape(Cin, Ctot).astype(jnp.bfloat16)
    b2d = jnp.tile(b_t, 4).reshape(1, Ctot).astype(jnp.float32)
    if Cpad != Ctot:
        w2d = jnp.pad(w2d, ((0, 0), (0, Cpad - Ctot)))
        b2d = jnp.pad(b2d, ((0, 0), (0, Cpad - Ctot)))

    tm = _pick_tile(M, 64, 8)
    tn = _pick_tile(Cpad, 1024, 128)

    kern = functools.partial(_matmul_bias_kernel, activation=activation)
    out2d = pl.pallas_call(
        kern,
        out_shape=jax.ShapeDtypeStruct((M, Cpad), jnp.float32),
        grid=(M // tm, Cpad // tn),
        in_specs=[
            pl.BlockSpec((tm, Cin), lambda i, j: (i, 0)),
            pl.BlockSpec((Cin, tn), lambda i, j: (0, j)),
            pl.BlockSpec((1, tn), lambda i, j: (0, j)),
        ],
        out_specs=pl.BlockSpec((tm, tn), lambda i, j: (i, j)),
        compiler_params=pltpu.CompilerParams(
            dimension_semantics=("parallel", "parallel")),
    )(x2d, w2d, b2d)

    if Cpad != Ctot:
        out2d = out2d[:, :Ctot]
    # TODO(synk): scatter the 2x2 taps directly from the kernel (strided store)
    # to avoid this XLA transpose round trip of the upsampled activation.
    y = out2d.reshape(N, H, W, 2, 2, Cout)
    y = jnp.transpose(y, (0, 1, 3, 2, 4, 5)).reshape(N, 2 * H, 2 * W, Cout)
    return y


# ----------------------------------------------------------------------------
# Kernel 2: 3x3 SAME conv on a flattened padded activation (9 x 2-D bf16 dots
#           into one f32 accumulator), optional fused ReLU.
# ----------------------------------------------------------------------------
def _conv3x3_kernel(x_ref, w_ref, b_ref, m_ref, o_ref, *, Wp, th, apply_relu):
    # x_ref: (rows_img, Cin) f32 — one padded image flattened over (h, w)
    # w_ref: (9, Cin, Cout) bf16 ; b_ref: (1, Cout) f32 ; m_ref: (th*Wp, 1) f32
    # o_ref: (th*Wp, Cout)
    t = pl.program_id(1)
    rows = th * Wp
    q0 = (t * th + 2) * Wp                      # first flat row of this row-tile
    Co = w_ref.shape[-1]
    acc = jnp.zeros((rows, Co), jnp.float32)
    for ky in range(3):
        for kx in range(3):
            off = (ky - 1) * Wp + (kx - 1)
            xs = x_ref[pl.ds(q0 + off, rows), :].astype(jnp.bfloat16)
            acc = acc + jnp.dot(xs, w_ref[ky * 3 + kx],
                                preferred_element_type=jnp.float32)
    acc = acc + b_ref[...]
    if apply_relu:
        acc = jnp.maximum(acc, 0.0)
    acc = acc * m_ref[...]                      # zero the W-padding columns
    o_ref[...] = acc.astype(o_ref.dtype)


def _hpad_extra(H, Wp):
    extra = 0
    while ((H + 4 + extra) * Wp) % 8 != 0:
        extra += 1
    return extra


def conv3x3_flat(xflat, N, H, W, Wp, w_pt, b, *, apply_relu):
    """Conv2d(k=3, s=1, p=1) on a flattened, spatially padded activation.

    xflat : (N * (H+4+extra) * Wp, Cin) f32 — W padded by one zero column per
            side, H padded by (2, 2+extra) zero rows, then flattened over (h, w).
    out   : (N * H * Wp, Cout) f32, the two W-pad columns zeroed.
    """
    Co, Ci = w_pt.shape[0], w_pt.shape[1]
    rows_img = xflat.shape[0] // N

    n_ht = 2 if (H % 2 == 0 and ((H // 2) * Wp) % 8 == 0) else 1
    th = H // n_ht

    w9 = jnp.transpose(w_pt, (2, 3, 1, 0)).reshape(9, Ci, Co).astype(jnp.bfloat16)
    b2d = b.reshape(1, Co).astype(jnp.float32)
    col = jnp.arange(Wp)
    mask = jnp.tile(((col >= 1) & (col <= W)).astype(jnp.float32), th)
    mask = mask.reshape(th * Wp, 1)

    kern = functools.partial(_conv3x3_kernel, Wp=Wp, th=th, apply_relu=apply_relu)
    return pl.pallas_call(
        kern,
        out_shape=jax.ShapeDtypeStruct((N * H * Wp, Co), jnp.float32),
        grid=(N, n_ht),
        in_specs=[
            pl.BlockSpec((rows_img, Ci), lambda n, t: (n, 0)),
            pl.BlockSpec((9, Ci, Co), lambda n, t: (0, 0, 0)),
            pl.BlockSpec((1, Co), lambda n, t: (0, 0)),
            pl.BlockSpec((th * Wp, 1), lambda n, t: (0, 0)),
        ],
        out_specs=pl.BlockSpec((th * Wp, Co), lambda n, t: (n * n_ht + t, 0)),
        compiler_params=pltpu.CompilerParams(
            dimension_semantics=("parallel", "parallel")),
    )(xflat, w9, b2d, mask)


# ----------------------------------------------------------------------------
# Kernel 3: BatchNorm2d (training-mode batch stats, eps=1e-5) + ReLU
#   pass 1: tiled sum / sum-of-squares reduction (resident (1,C) accumulators)
#   pass 2: tiled affine + ReLU
# The W-pad columns of the input are exactly zero, so they do not perturb the
# sums; dividing by the true valid-pixel count gives exact batch statistics.
# ----------------------------------------------------------------------------
def _bn_stats_kernel(x_ref, sum_ref, ssq_ref):
    @pl.when(pl.program_id(0) == 0)
    def _():
        sum_ref[...] = jnp.zeros_like(sum_ref)
        ssq_ref[...] = jnp.zeros_like(ssq_ref)

    x = x_ref[...]
    sum_ref[...] += jnp.sum(x, axis=0, keepdims=True)
    ssq_ref[...] += jnp.sum(x * x, axis=0, keepdims=True)


def _bn_norm_kernel(x_ref, s_ref, t_ref, o_ref):
    o_ref[...] = jnp.maximum(x_ref[...] * s_ref[...] + t_ref[...], 0.0)


def batchnorm_relu_flat(xflat, count, gamma, beta, *, eps=1e-5):
    R, C = xflat.shape
    tm = _pick_tile(R, 256, 8)
    nblk = R // tm

    ssum, ssq = pl.pallas_call(
        _bn_stats_kernel,
        out_shape=(jax.ShapeDtypeStruct((1, C), jnp.float32),
                   jax.ShapeDtypeStruct((1, C), jnp.float32)),
        grid=(nblk,),
        in_specs=[pl.BlockSpec((tm, C), lambda i: (i, 0))],
        out_specs=(pl.BlockSpec((1, C), lambda i: (0, 0)),
                   pl.BlockSpec((1, C), lambda i: (0, 0))),
        compiler_params=pltpu.CompilerParams(dimension_semantics=("arbitrary",)),
    )(xflat)

    mean = ssum / count
    var = jnp.maximum(ssq / count - mean * mean, 0.0)
    scale = gamma.reshape(1, C).astype(jnp.float32) * jax.lax.rsqrt(var + eps)
    shift = beta.reshape(1, C).astype(jnp.float32) - mean * scale

    return pl.pallas_call(
        _bn_norm_kernel,
        out_shape=jax.ShapeDtypeStruct((R, C), jnp.float32),
        grid=(nblk,),
        in_specs=[pl.BlockSpec((tm, C), lambda i: (i, 0)),
                  pl.BlockSpec((1, C), lambda i: (0, 0)),
                  pl.BlockSpec((1, C), lambda i: (0, 0))],
        out_specs=pl.BlockSpec((tm, C), lambda i: (i, 0)),
        compiler_params=pltpu.CompilerParams(dimension_semantics=("parallel",)),
    )(xflat, scale, shift)


# ----------------------------------------------------------------------------
# DecoderBlock forward
# ----------------------------------------------------------------------------
def decoder_block_forward(x_nchw, params, *, is_last=False):
    x = jnp.transpose(x_nchw, (0, 2, 3, 1)).astype(jnp.bfloat16)  # NCHW -> NHWC
    y = conv_transpose_2x2_s2(x, params["wt"], params["bt"],
                              activation="tanh" if is_last else None)
    if is_last:
        return jnp.transpose(y, (0, 3, 1, 2))

    N, H, W, C = y.shape
    Wp = W + 2
    extra = _hpad_extra(H, Wp)

    # conv1 + ReLU
    ypad = jnp.pad(y, ((0, 0), (2, 2 + extra), (1, 1), (0, 0)))
    yflat = ypad.reshape(N * (H + 4 + extra) * Wp, C)
    h1 = conv3x3_flat(yflat, N, H, W, Wp, params["w1"], params["b1"],
                      apply_relu=True)

    # conv2 (W-pad columns of h1 are already zeroed in-kernel -> only re-pad H)
    # TODO(synk): fuse conv1+ReLU+conv2 into one pallas_call with the
    # intermediate tile kept in VMEM to remove this HBM round trip.
    h1pad = jnp.pad(h1.reshape(N, H, Wp, C),
                    ((0, 0), (2, 2 + extra), (0, 0), (0, 0)))
    h1flat = h1pad.reshape(N * (H + 4 + extra) * Wp, C)
    h2 = conv3x3_flat(h1flat, N, H, W, Wp, params["w2"], params["b2"],
                      apply_relu=False)

    # BatchNorm2d (batch statistics) + ReLU
    z = batchnorm_relu_flat(h2, count=N * H * W,
                            gamma=params["gamma"], beta=params["beta"])
    z = z.reshape(N, H, Wp, C)[:, :, 1:1 + W, :]
    return jnp.transpose(z, (0, 3, 1, 2))      # NHWC -> NCHW


# ----------------------------------------------------------------------------
# Pure-JAX reference (same bf16 operand quantization, f32 accumulation)
# ----------------------------------------------------------------------------
def reference_forward(x_nchw, p, *, is_last=False):
    bf = jnp.bfloat16
    x = jnp.transpose(x_nchw, (0, 2, 3, 1)).astype(bf)
    N, H, W, Cin = x.shape
    Cout = p["wt"].shape[1]
    wt = p["wt"].astype(bf)
    y = jnp.zeros((N, 2 * H, 2 * W, Cout), jnp.float32)
    for ki in range(2):
        for kj in range(2):
            y = y.at[:, ki::2, kj::2, :].set(
                jnp.einsum("nhwc,cd->nhwd", x, wt[:, :, ki, kj],
                           preferred_element_type=jnp.float32))
    y = y + p["bt"].astype(jnp.float32)
    if is_last:
        return jnp.transpose(jnp.tanh(y), (0, 3, 1, 2))

    def conv(xi, w_pt, b):
        w = jnp.transpose(w_pt, (2, 3, 1, 0)).astype(bf)
        return jax.lax.conv_general_dilated(
            xi.astype(bf), w, (1, 1), "SAME",
            dimension_numbers=("NHWC", "HWIO", "NHWC"),
            preferred_element_type=jnp.float32) + b

    y = jnp.maximum(conv(y, p["w1"], p["b1"]), 0.0)
    z = conv(y, p["w2"], p["b2"])
    mean = jnp.mean(z, axis=(0, 1, 2), keepdims=True)
    var = jnp.mean((z - mean) ** 2, axis=(0, 1, 2), keepdims=True)
    z = (z - mean) / jnp.sqrt(var + 1e-5) * p["gamma"] + p["beta"]
    z = jnp.maximum(z, 0.0)
    return jnp.transpose(z, (0, 3, 1, 2))


if __name__ == "__main__":
    # DecoderBlock(in=1024, out=512) on (1,1024,8,8), scaled down:
    N, Cin, Cout, H, W = 2, 32, 16, 8, 8
    key = jax.random.PRNGKey(0)
    ks = jax.random.split(key, 7)

    x = jax.random.normal(ks[0], (N, Cin, H, W), jnp.float32)
    params = {
        "wt": jax.random.normal(ks[1], (Cin, Cout, 2, 2), jnp.float32)
              * (1.0 / (Cin * 4) ** 0.5),
        "bt": jax.random.normal(ks[2], (Cout,), jnp.float32) * 0.05,
        "w1": jax.random.normal(ks[3], (Cout, Cout, 3, 3), jnp.float32)
              * (1.0 / (Cout * 9) ** 0.5),
        "b1": jax.random.normal(ks[4], (Cout,), jnp.float32) * 0.05,
        "w2": jax.random.normal(ks[5], (Cout, Cout, 3, 3), jnp.float32)
              * (1.0 / (Cout * 9) ** 0.5),
        "b2": jax.random.normal(ks[6], (Cout,), jnp.float32) * 0.05,
        "gamma": jnp.ones((Cout,), jnp.float32),
        "beta": jnp.zeros((Cout,), jnp.float32),
    }

    out = jax.block_until_ready(decoder_block_forward(x, params, is_last=False))
    assert out.shape == (N, Cout, 2 * H, 2 * W), out.shape
    ref = jax.block_until_ready(reference_forward(x, params, is_last=False))
    assert jnp.allclose(out, ref, atol=1e-2, rtol=1e-2), (
        float(jnp.max(jnp.abs(out - ref))))

    out_last = jax.block_until_ready(decoder_block_forward(x, params, is_last=True))
    ref_last = jax.block_until_ready(reference_forward(x, params, is_last=True))
    assert out_last.shape == (N, Cout, 2 * H, 2 * W), out_last.shape
    assert jnp.allclose(out_last, ref_last, atol=1e-2, rtol=1e-2), (
        float(jnp.max(jnp.abs(out_last - ref_last))))

    print("KERNEL_OK")
</pallas_src>

<mosaic_0001>
module attributes {stable_mosaic.version = 11 : i64} {
  func.func @_matmul_bias_kernel(%arg0: i32, %arg1: i32, %arg2: memref<64x32xbf16, #tpu.memory_space<vmem>>, %arg3: memref<32x128xbf16, #tpu.memory_space<vmem>>, %arg4: memref<1x128xf32, #tpu.memory_space<vmem>>, %arg5: memref<64x128xf32, #tpu.memory_space<vmem>>) attributes {dimension_semantics = [#tpu.dimension_semantics<parallel>, #tpu.dimension_semantics<parallel>], iteration_bounds = array<i64: 2, 1>, scalar_prefetch = 0 : i64, scratch_operands = 0 : i64, tpu.core_type = #tpu.core_type<tc>, window_params = [{transform_indices = @transform_0, window_bounds = array<i64: 64, 32>}, {transform_indices = @transform_1, window_bounds = array<i64: 32, 128>}, {transform_indices = @transform_2, window_bounds = array<i64: 1, 128>}, {transform_indices = @transform_3, window_bounds = array<i64: 64, 128>}]} {
    %c0 = arith.constant 0 : index
    %c0_0 = arith.constant 0 : index
    %0 = vector.load %arg2[%c0, %c0_0] : memref<64x32xbf16, #tpu.memory_space<vmem>>, vector<64x32xbf16>
    %c0_1 = arith.constant 0 : index
    %c0_2 = arith.constant 0 : index
    %1 = vector.load %arg3[%c0_1, %c0_2] : memref<32x128xbf16, #tpu.memory_space<vmem>>, vector<32x128xbf16>
    %cst = arith.constant dense<0.000000e+00> : vector<64x128xf32>
    %2 = tpu.matmul %0, %1, %cst {dimension_numbers = #tpu.dot_dimension_numbers<[1], [0], [0], [1], [0, 0, 1, 1], [], []>} : vector<64x32xbf16>, vector<32x128xbf16>, vector<64x128xf32> -> vector<64x128xf32>
    %c0_3 = arith.constant 0 : index
    %c0_4 = arith.constant 0 : index
    %3 = vector.load %arg4[%c0_3, %c0_4] : memref<1x128xf32, #tpu.memory_space<vmem>>, vector<1x128xf32>
    %4 = vector.broadcast %3 : vector<1x128xf32> to vector<64x128xf32>
    %5 = arith.addf %2, %4 : vector<64x128xf32>
    %c0_5 = arith.constant 0 : index
    %c0_6 = arith.constant 0 : index
    %6 = vector.load %arg5[%c0_5, %c0_6] : memref<64x128xf32, #tpu.memory_space<vmem>>, vector<64x128xf32>
    tpu.vector_store %arg5[%c0_5, %c0_6], %5 {strides = array<i32>} : memref<64x128xf32, #tpu.memory_space<vmem>>, vector<64x128xf32>,
    return
  }
  func.func @transform_0(%arg0: i32, %arg1: i32) -> (i32, i32) {
    %c0_i32 = arith.constant 0 : i32
    %c0_i32_0 = arith.constant 0 : i32
    return %arg0, %c0_i32 : i32, i32
  }
  func.func @transform_1(%arg0: i32, %arg1: i32) -> (i32, i32) {
    %c0_i32 = arith.constant 0 : i32
    %c0_i32_0 = arith.constant 0 : i32
    return %c0_i32, %arg1 : i32, i32
  }
  func.func @transform_2(%arg0: i32, %arg1: i32) -> (i32, i32) {
    %c0_i32 = arith.constant 0 : i32
    %c0_i32_0 = arith.constant 0 : i32
    return %c0_i32, %arg1 : i32, i32
  }
  func.func @transform_3(%arg0: i32, %arg1: i32) -> (i32, i32) {
    %c0_i32 = arith.constant 0 : i32
    return %arg0, %arg1 : i32, i32
  }
}

</mosaic_0001>

<bundles_post_ra>
// kernel: tpu_custom_call.1
= control target key start
LH: loop header
LB: loop body
LE: loop exit
PB: predicated region body
PF: predicated region fallthrough
CT: control target
= control target key end

     0   :  { %8 = vsyncpa [#allocation3], 0  ;;  %s757_s0 = inlined_call_operand.vmem [shape: bf16[128,32], index: 0, kind: input, shape index: {}]   ;;  %s758_s1 = inlined_call_operand.vmem [shape: bf16[32,128], index: 1, kind: input, shape index: {}]   ;;  %s759_s2 = inlined_call_operand.vmem [shape: f32[1,128], index: 2, kind: input, shape index: {}]   ;;  %s760_s3 = inlined_call_operand.hbm [shape: f32[128,128], index: 3, kind: output, shape index: {}]  }
   0x1   :  { %10 = vsyncpa [#allocation3 + $0x1], 0  ;;  %s648_s12 = smov 0   ;;  %s650_s13 = smov 0  }
   0x2   :  { %s652_s14 = smov 0   ;;  %s654_s15 = smov 0  }
   0x3   :  { %s656_s16 = smov 0   ;;  %s658_s17 = smov 0  }
   0x4 LB: > { %s432_s18 = sadd.s32 4294967295, %s624_s17   ;;  %s433_s19 = sadd.s32 4294967294, %s624_s17   ;;  %s624_s17 = sphi %s658_s17, %s16_s17   ;;  %s620_s16 = sphi %s656_s16, %s767_s16   ;;  %s616_s15 = sphi %s654_s15, %s766_s15   ;;  %s612_s14 = sphi %s652_s14, %s765_s14   ;;  %s608_s13 = sphi %s650_s13, %s764_s13   ;;  %s604_s12 = sphi %s648_s12, %s763_s12  }
   0x5   : > { %s28_s20 = sadd.s32 1, %s620_s16  ;;  %s115_s21 = sadd.s32 1, %s612_s14 }
   0x6   : > { %p30_p0 = scmp.ge.s32.totalorder %s28_s20, 2  ;;  %p125_p1 = scmp.ne.s32.totalorder %s612_s14, %s608_s13 }
   0x7   : > { %p126_p2 = scmp.eq.s32.totalorder %s432_s18, 1  ;;  %p131_p3 = scmp.ne.s32.totalorder %s608_s13, %s604_s12 }
   0x8   : > { %s769_s20 = smov (%p30_p0, %s28_s20), 0  ;;  %p132_p5 = scmp.eq.s32.totalorder %s433_s19, 1 }
   0x9   : > { %p688_p4 = por %p126_p2, %p125_p1  ;;  %s110_s23 = ssub.s32 %s620_s16, %s769_s20 }
   0xa   : > { %p438_p6 = scmp.ge.s32.totalorder %s624_s17, 1  ;;  %p113_p7 = scmp.eq.s32.totalorder %s110_s23, 0 }
   0xb   : > { %p695_p8 = por %p132_p5, %p131_p3  ;;  %p172_p9 = scmp.lt.s32.totalorder %s624_s17, 3 }
   0xc   : > { %s701_s25 = scalar_select %p113_p7, %s612_s14, %s115_s21  }
   0xd   : > { %p173_p10 = pnand %p438_p6, %p172_p9 }
   0xe   : > { %s440_s28 = sshll.u32 (!%p173_p10), %s616_s15, 3  ;;  %s200_s8 = sand.u32 (!%p173_p10), 1, %s608_s13  }
   0xf   : > { %176 = sbr.rel (%p173_p10) target bundleno = 176 (0xb0), region = 32  ;;  %p204_p11 = scmp.lt.s32.totalorder (!%p173_p10), %s440_s28, 15 }
  0x10   : > { %s439_s9 = sshll.u32 (!%p173_p10), %s200_s8, 6  ;;  %s481_s19 = sshll.u32 (!%p173_p10), %s616_s15, 6 }
  0x11   : > { %s202_s18 = scalar_lea.vmem (!%p173_p10), [#allocation2], %s439_s9  ;;  %s329_s26 = scalar_lea.hbm (!%p173_p10), %s760_s3, %s481_s19 }
  0x12   : > { %s330_s27 = sshll.u32 (!%p173_p10), %s202_s18, 4  ;;  %s317_s15 = scalar_lea.sflag (!%p173_p10), [#allocation3], %s200_s8  ;;  %s331_s27 = int_to_ptr.vmem [resolvable:$true] %s330_s27 }
  0x13   : > { %s566_s6 = scalar_lea.hbm (!%p173_p10), %s760_s3, 128 }
  0x14   : > { %v480_v0 = vld [vmem:[%s758_s1 + $0x8] sm:$0xff]  ;;  %v479_v1 = vld [vmem:[%s758_s1] sm:$0xff]  ;;  %s771_s28 = smov (!%p204_p11, %s440_s28), 15  ;;  %vm266_vm0 = vcmask 261120  }
  0x15   : > { %285 = vmatpush.bf16.msra.mxu0 %v480_v0  ;;  %482 = vmatpush.bf16.msra.mxu1 %v480_v0  ;;  %s441_s4 = sshll.u32 %s771_s28, 2  ;;  %v545_v6 = vld [vmem:[%s759_s2] ss:$0 sm:$0xff]  ;;  %s332_s28 = sshll.u32 %s329_s26, 4  ;;  %s333_s28 = int_to_ptr.hbm [resolvable:$true] %s332_s28 }
  0x16   : > { %483 = vmatpush.bf16.msra.mxu2 %v480_v0  ;;  %484 = vmatpush.bf16.msra.mxu3 %v480_v0  ;;  %s207_s7 = scalar_lea.vmem %s757_s0, %s441_s4  ;;  %s560_s29 = sshra.s32 %s333_s28, 4  ;;  %s561_s29 = int_to_ptr.hbm [resolvable:$true] %s560_s29 }
  0x17   : > { %v475_v2 = vld [vmem:[%s207_s7] sm:$0xff]  ;;  %v476_v3 = vld [vmem:[%s207_s7 + $0x8] sm:$0xff]  ;;  %v477_v4 = vld [vmem:[%s207_s7 + $0x10] sm:$0xff]  ;;  %s562_s30 = scalar_lea.hbm %s561_s29, 64  ;;  %p567_p1 = scmp.lt.s32.totalorder %s561_s29, %s760_s3 }
  0x18   : > { %v478_v5 = vld [vmem:[%s207_s7 + $0x18] sm:$0xff]  ;;  %p563_p12 = scmp.ne.s32.totalorder %s561_s29, %s562_s30  ;;  %p568_p2 = scmp.lt.s32.totalorder %s566_s6, %s562_s30 }
  0x19   : > { %286 = vmatpush.bf16.msra.mxu0 %v479_v1  ;;  %485 = vmatpush.bf16.msra.mxu1 %v479_v1 }
  0x1a   : > { %486 = vmatpush.bf16.msra.mxu2 %v479_v1  ;;  %487 = vmatpush.bf16.msra.mxu3 %v479_v1  ;;  %p564_p13 = pnand %p563_p12, %p688_p4  ;;  %p569_p3 = por %p568_p2, %p567_p1 }
  0x1c   : > { %466 = vmatmul.msk.bf16.vlgmr.msra.gmra.mxu0 %vm266_vm0, %v475_v2  ;;  %467 = vmatmul.msk.bf16.vlgmr.msra.gmra.mxu1 %vm266_vm0, %v476_v3  ;;  %p565_p0 = pneg %p564_p13 }
  0x1d   : > { %468 = vmatmul.msk.bf16.vlgmr.msra.gmra.mxu2 %vm266_vm0, %v477_v4  ;;  %469 = vmatmul.msk.bf16.vlgmr.msra.gmra.mxu3 %vm266_vm0, %v478_v5 }
  0x1e   : > { %p570_p5 = pnand %p569_p3, %p565_p0 }
  0x99   : > { %v288_v7 = vpop.f32.mrf.mxu0  ;;  %v293_v8 = vpop.f32.mrf.mxu1 }
  0x9a   : > { %v289_v9 = vadd.f32 %v545_v6, %v288_v7  ;;  %v294_v10 = vadd.f32 %v545_v6, %v293_v8 }
  0x9c   : > { %308 = vst [vmem:[%s202_s18] sm:$0xff] %v289_v9 }
  0x9d   : > { %310 = vst [vmem:[%s202_s18 + $0x10] sm:$0xff] %v294_v10 }
  0xa0   : > { %v298_v11 = vpop.f32.mrf.mxu2  ;;  %v303_v12 = vpop.f32.mrf.mxu3 }
  0xa1   : > { %v299_v13 = vadd.f32 %v545_v6, %v298_v11  ;;  %v304_v14 = vadd.f32 %v545_v6, %v303_v12  ;;  %v290_v15 = vpop.f32.mrf.mxu0  ;;  %v295_v16 = vpop.f32.mrf.mxu1 }
  0xa2   : > { %v291_v17 = vadd.f32 %v545_v6, %v290_v15  ;;  %v296_v18 = vadd.f32 %v545_v6, %v295_v16 }
  0xa3   : > { %312 = vst [vmem:[%s202_s18 + $0x20] sm:$0xff] %v299_v13 }
  0xa4   : > { %314 = vst [vmem:[%s202_s18 + $0x30] sm:$0xff] %v304_v14 }
  0xa5   : > { %309 = vst [vmem:[%s202_s18 + $0x8] sm:$0xff] %v291_v17 }
  0xa6   : > { %311 = vst [vmem:[%s202_s18 + $0x18] sm:$0xff] %v296_v18 }
  0xa8   : > { %v300_v19 = vpop.f32.mrf.mxu2  ;;  %v305_v20 = vpop.f32.mrf.mxu3 }
  0xa9   : > { %v301_v21 = vadd.f32 %v545_v6, %v300_v19  ;;  %v306_v22 = vadd.f32 %v545_v6, %v305_v20 }
  0xab   : > { %313 = vst [vmem:[%s202_s18 + $0x28] sm:$0xff] %v301_v21 }
  0xac   : > { %315 = vst [vmem:[%s202_s18 + $0x38] sm:$0xff] %v306_v22 }
  0xad   : > { %573 = shalt.err (!%p570_p5)
}
  0xae   : > { %s626_s8 = smov 128   ;;  %s627_s10 = smov 8  }
  0xaf   : > { %488 = dma.vmem_to_hbm [thread:$0]  (%p688_p4), %s331_s27, 1024, %s333_s28, %s317_s15, %s626_s8, %s626_s8, %s627_s10  }
  0xb0 PF: > { %p494_p6 = scmp.ge.s32.totalorder %s624_s17, 2  ;;  %s347_s11 = sand.u32 1, %s604_s12  }
  0xb1   : > { %s348_s18 = scalar_lea.sflag [#allocation3], %s347_s11 }
  0xb2   : > { %p491_p7 = pnand %p494_p6, %p695_p8 }
  0xb4   : > { %p492_p9 = pneg %p491_p7 }
  0xb6   : > { %599 = dma.done.wait (%p492_p9), %s348_s18, 1024  }
  0xb7   : > { %601 = vsyncadd (%p492_p9), %s348_s18, 4294966272  ;;  %s16_s17 = sadd.s32 1, %s624_s17   ;;  %s763_s12 = smov %s608_s13 }
  0xb8   : > { %p13_p10 = scmp.ge.s32.totalorder %s16_s17, 4   ;;  %s764_s13 = smov %s612_s14 }
  0xb9   : > { %s765_s14 = smov %s701_s25  ;;  %s766_s15 = smov %s620_s16 }
  0xba   : > { %s767_s16 = smov %s769_s20  ;;  %15 = sbr.rel (!%p13_p10) target bundleno = 4 (0x4), region = 73 }
  0xbf   :  { %354 = vsyncpa [#allocation3], 1 }
  0xc0   :  { %356 = vsyncpa [#allocation3 + $0x1], 1 }

</bundles_post_ra>
